<compile_context>
chip_gen: v5e
topology: v5e:2x2
jax: 0.10.0
libtpu: 0.0.40
codegen_flags: <defaults>
</compile_context>

<pallas_src>
import jax
import jax.numpy as jnp
from jax import lax
from jax.experimental import pallas as pl
from jax.experimental.pallas import tpu as pltpu

C_IN, C_OUT, K, STRIDE = 3, 3, 8, 8
F = C_IN * K * K                    # 192 patch features, row order (c, kh, kw)
BN_EPS = 1e-3                       # nn.BatchNorm2d(3, eps=0.001)
TARGET_STEP_BYTES = 8 * 1024 * 1024  # target input DMA per grid step


def _make_kernel(HB, Wo):
    """Kernel for one (1, 3, 8*HB, W) native-NCHW row block."""
    KK = K * K

    def kernel(bn_ref, x_ref, w_ref, b_ref, o_ref):
        # bn_ref: SMEM (2, 3)  row 0 = per-channel BN scale, row 1 = shift
        # x_ref : VMEM (1, 3, 8*HB, W) native NCHW rows
        # w_ref : VMEM (3, 192) conv weight, feature order (c, kh, kw)
        # b_ref : VMEM (3, 1)   conv bias
        # o_ref : VMEM (1, HB, 3, Wo)
        w2 = w_ref[...]                       # (3, 192)
        bias = b_ref[...]                     # (3, 1)

        def row_group(hb, carry):
            r0 = pl.multiple_of(hb * K, K)
            y = jnp.zeros((C_OUT, Wo), jnp.float32)
            for c in range(C_IN):             # static 3-iteration loop
                xc = x_ref[0, c, pl.ds(r0, K), :].astype(jnp.float32)      # (8, W)
                # BN affine (batch stats folded in wrapper) + ReLU.
                hc = jnp.maximum(xc * bn_ref[0, c] + bn_ref[1, c], 0.0)
                # In-VMEM patch rearrangement:
                # (kh, wo*8+kw) -> (kh, wo, kw) -> (kh, kw, wo) -> (64, Wo)
                p = hc.reshape(K, Wo, K).transpose(0, 2, 1).reshape(KK, Wo)
                # Conv as matmul on the MXU, accumulated over input channels.
                y = y + jnp.dot(w2[:, c * KK:(c + 1) * KK], p,
                                preferred_element_type=jnp.float32,
                                precision=lax.Precision.HIGHEST)
            o_ref[0, hb] = (jnp.tanh(y + bias) + 1.0) * 0.5                # (3, Wo)
            return carry

        lax.fori_loop(0, HB, row_group, 0)

    return kernel


@jax.jit
def context_extractor(x, conv_w, conv_b, gamma, beta):
    """x: (N, 3, H, W), H and W divisible by 8. Returns (N, 3, H//8, W//8) float32."""
    N, C, H, W = x.shape
    assert C == C_IN and H % STRIDE == 0 and W % STRIDE == 0
    Ho, Wo = H // STRIDE, W // STRIDE
    M = N * Ho * Wo

    # --- BatchNorm2d training-mode batch statistics, single fused pass over x.
    # Shifted (per-channel pivot) sum of squares avoids E[x^2]-E[x]^2 cancellation
    # while still letting XLA fuse both reductions into one read of x.
    xf = x.astype(jnp.float32)
    pivot = xf[:1, :, :1, :1]                                    # (1, 3, 1, 1)
    mean = jnp.mean(xf, axis=(0, 2, 3))                          # (3,)
    msq = jnp.mean(jnp.square(xf - pivot), axis=(0, 2, 3))       # E[(x - p)^2]
    var = msq - jnp.square(mean - pivot.reshape(C))              # biased variance
    scale = gamma.astype(jnp.float32) * lax.rsqrt(var + BN_EPS)  # (3,)
    shift = beta.astype(jnp.float32) - mean * scale              # (3,)
    bn = jnp.stack([scale, shift])                               # (2, 3) -> SMEM

    w2 = conv_w.reshape(C_OUT, F).astype(jnp.float32)            # (3, 192)
    b_col = conv_b.reshape(C_OUT, 1).astype(jnp.float32)         # (3, 1)

    # --- Tiling: each grid step covers HB output rows = 8*HB native image rows
    # at full width W, sized so a step moves ~TARGET_STEP_BYTES, with at least
    # 4 grid steps when possible so v7x's two TensorCores both get work.
    row_bytes = C_IN * K * W * x.dtype.itemsize                  # one 8-row group
    HB = max(1, min(Ho, TARGET_STEP_BYTES // row_bytes))
    while HB > 1 and N * pl.cdiv(Ho, HB) < 4:
        HB = max(1, HB // 2)
    G = pl.cdiv(Ho, HB)
    R = K * HB

    block_bytes = C_IN * R * W * x.dtype.itemsize
    vmem_limit = int(min(48 * 2**20, max(16 * 2**20, 3 * block_bytes + 2 * 2**20)))

    cost = pl.CostEstimate(
        flops=3 * N * C_IN * H * W + 2 * M * F * C_OUT,
        transcendentals=M * C_OUT,
        bytes_accessed=x.size * x.dtype.itemsize
        + 4 * (M * C_OUT + 2 * C_IN + C_OUT * (F + 1)),
    )

    out = pl.pallas_call(
        _make_kernel(HB, Wo),
        out_shape=jax.ShapeDtypeStruct((N, Ho, C_OUT, Wo), jnp.float32),
        grid=(N, G),
        in_specs=[
            pl.BlockSpec(memory_space=pltpu.MemorySpace.SMEM),            # BN scale/shift
            pl.BlockSpec((1, C_IN, R, W), lambda n, g: (n, 0, g, 0)),     # native rows
            pl.BlockSpec((C_OUT, F), lambda n, g: (0, 0)),                # conv weight
            pl.BlockSpec((C_OUT, 1), lambda n, g: (0, 0)),                # conv bias
        ],
        out_specs=pl.BlockSpec((1, HB, C_OUT, Wo), lambda n, g: (n, g, 0, 0)),
        compiler_params=pltpu.CompilerParams(
            dimension_semantics=("parallel", "parallel"),
            vmem_limit_bytes=vmem_limit,
        ),
        cost_estimate=cost,
    )(bn, x, w2, b_col)

    # (N, Ho, 3, Wo) -> (N, 3, Ho, Wo); output is 64x smaller than x, negligible.
    return out.transpose(0, 2, 1, 3)


def _reference(x, conv_w, conv_b, gamma, beta):
    """Pure-JAX reference matching PyTorch forward (fresh module => training-mode BN)."""
    mean = jnp.mean(x, axis=(0, 2, 3), keepdims=True)
    var = jnp.mean((x - mean) ** 2, axis=(0, 2, 3), keepdims=True)   # biased
    xb = (x - mean) / jnp.sqrt(var + BN_EPS)
    xb = xb * gamma.reshape(1, -1, 1, 1) + beta.reshape(1, -1, 1, 1)
    xr = jnp.maximum(xb, 0.0)
    y = jax.lax.conv_general_dilated(
        xr, conv_w, window_strides=(STRIDE, STRIDE), padding="VALID",
        dimension_numbers=("NCHW", "OIHW", "NCHW"),
        precision=lax.Precision.HIGHEST)
    y = y + conv_b.reshape(1, -1, 1, 1)
    return (jnp.tanh(y) + 1.0) / 2.0


if __name__ == "__main__":
    key = jax.random.PRNGKey(0)
    kx, kw_, kb, kg, kbe = jax.random.split(key, 5)

    # Small deterministic input consistent with the module: NCHW, 3 channels,
    # spatial dims divisible by the 8x8/stride-8 conv.
    N, H, W = 2, 16, 16
    x = jax.random.normal(kx, (N, C_IN, H, W), dtype=jnp.float32)

    # Deterministic parameter init (Conv2d(3,3,8,8): fan_in = 3*8*8 = 192).
    fan_in = C_IN * K * K
    bound = 1.0 / jnp.sqrt(jnp.float32(fan_in))
    conv_w = jax.random.uniform(kw_, (C_OUT, C_IN, K, K), jnp.float32, -bound, bound)
    conv_b = jax.random.uniform(kb, (C_OUT,), jnp.float32, -bound, bound)
    gamma = 1.0 + 0.1 * jax.random.normal(kg, (C_IN,), dtype=jnp.float32)
    beta = 0.1 * jax.random.normal(kbe, (C_IN,), dtype=jnp.float32)

    out = jax.block_until_ready(context_extractor(x, conv_w, conv_b, gamma, beta))

    ref = _reference(x, conv_w, conv_b, gamma, beta)
    assert out.shape == (N, C_OUT, H // STRIDE, W // STRIDE), out.shape
    err = float(jnp.max(jnp.abs(out - ref)))
    if not jnp.allclose(out, ref, atol=3e-5, rtol=3e-5):
        raise AssertionError(f"mismatch vs reference: max abs err {err}")

    print("KERNEL_OK")
</pallas_src>

<mosaic_0001>
module attributes {stable_mosaic.version = 11 : i64} {
  func.func @kernel(%arg0: i32, %arg1: i32, %arg2: memref<2x3xf32, #tpu.memory_space<smem>>, %arg3: memref<1x3x8x16xf32, #tpu.memory_space<vmem>>, %arg4: memref<3x192xf32, #tpu.memory_space<vmem>>, %arg5: memref<3x1xf32, #tpu.memory_space<vmem>>, %arg6: memref<1x1x3x2xf32, #tpu.memory_space<vmem>>) attributes {dimension_semantics = [#tpu.dimension_semantics<parallel>, #tpu.dimension_semantics<parallel>], iteration_bounds = array<i64: 2, 2>, scalar_prefetch = 0 : i64, scratch_operands = 0 : i64, tpu.core_type = #tpu.core_type<tc>, window_params = [{transform_indices = @transform_0, window_bounds = array<i64: 2, 3>}, {transform_indices = @transform_1, window_bounds = array<i64: 1, 3, 8, 16>}, {pipeline_mode = #tpu.pipeline_mode<synchronous>, transform_indices = @transform_2, window_bounds = array<i64: 3, 192>}, {pipeline_mode = #tpu.pipeline_mode<synchronous>, transform_indices = @transform_3, window_bounds = array<i64: 3, 1>}, {transform_indices = @transform_4, window_bounds = array<i64: 1, 1, 3, 2>}]} {
    %c0 = arith.constant 0 : index
    %c0_0 = arith.constant 0 : index
    %0 = vector.load %arg4[%c0, %c0_0] : memref<3x192xf32, #tpu.memory_space<vmem>>, vector<3x192xf32>
    %c0_1 = arith.constant 0 : index
    %c0_2 = arith.constant 0 : index
    %1 = vector.load %arg5[%c0_1, %c0_2] : memref<3x1xf32, #tpu.memory_space<vmem>>, vector<3x1xf32>
    %c0_i32 = arith.constant 0 : i32
    %c8_i32 = arith.constant 8 : i32
    %2 = arith.muli %c0_i32, %c8_i32 : i32
    %3 = tpu.assume_multiple %2, 8 : i32
    %cst = arith.constant 0.000000e+00 : f32
    %4 = vector.broadcast %cst : f32 to vector<3x2xf32>
    %c0_3 = arith.constant 0 : index
    %c0_4 = arith.constant 0 : index
    %5 = arith.index_cast %3 : i32 to index
    %c0_5 = arith.constant 0 : index
    %6 = vector.load %arg3[%c0_3, %c0_4, %5, %c0_5] : memref<1x3x8x16xf32, #tpu.memory_space<vmem>>, vector<1x1x8x16xf32>
    %7 = vector.shape_cast %6 : vector<1x1x8x16xf32> to vector<8x16xf32>
    %c0_6 = arith.constant 0 : index
    %c0_7 = arith.constant 0 : index
    %8 = memref.load %arg2[%c0_6, %c0_7] : memref<2x3xf32, #tpu.memory_space<smem>>
    %9 = vector.broadcast %8 : f32 to vector<8x16xf32>
    %10 = arith.mulf %7, %9 : vector<8x16xf32>
    %c1 = arith.constant 1 : index
    %c0_8 = arith.constant 0 : index
    %11 = memref.load %arg2[%c1, %c0_8] : memref<2x3xf32, #tpu.memory_space<smem>>
    %12 = vector.broadcast %11 : f32 to vector<8x16xf32>
    %13 = arith.addf %10, %12 : vector<8x16xf32>
    %cst_9 = arith.constant 0.000000e+00 : f32
    %14 = vector.broadcast %cst_9 : f32 to vector<8x16xf32>
    %15 = arith.maximumf %13, %14 : vector<8x16xf32>
    %16 = vector.shape_cast %15 : vector<8x16xf32> to vector<8x2x8xf32>
    %17 = tpu.transpose %16, [0, 2, 1] : vector<8x2x8xf32> -> vector<8x8x2xf32>
    %18 = vector.shape_cast %17 : vector<8x8x2xf32> to vector<64x2xf32>
    %19 = vector.extract_strided_slice %0 {offsets = [0, 0], sizes = [3, 64], strides = [1, 1]} : vector<3x192xf32> to vector<3x64xf32>
    %cst_10 = arith.constant dense<0.000000e+00> : vector<3x2xf32>
    %20 = tpu.matmul %19, %18, %cst_10 {dimension_numbers = #tpu.dot_dimension_numbers<[1], [0], [0], [1], [0, 0, 1, 1], [], []>, precision = #tpu.contract_precision<fp32>} : vector<3x64xf32>, vector<64x2xf32>, vector<3x2xf32> -> vector<3x2xf32>
    %21 = arith.addf %4, %20 : vector<3x2xf32>
    %c0_11 = arith.constant 0 : index
    %c1_12 = arith.constant 1 : index
    %22 = arith.index_cast %3 : i32 to index
    %c0_13 = arith.constant 0 : index
    %23 = vector.load %arg3[%c0_11, %c1_12, %22, %c0_13] : memref<1x3x8x16xf32, #tpu.memory_space<vmem>>, vector<1x1x8x16xf32>
    %24 = vector.shape_cast %23 : vector<1x1x8x16xf32> to vector<8x16xf32>
    %c0_14 = arith.constant 0 : index
    %c1_15 = arith.constant 1 : index
    %25 = memref.load %arg2[%c0_14, %c1_15] : memref<2x3xf32, #tpu.memory_space<smem>>
    %26 = vector.broadcast %25 : f32 to vector<8x16xf32>
    %27 = arith.mulf %24, %26 : vector<8x16xf32>
    %c1_16 = arith.constant 1 : index
    %c1_17 = arith.constant 1 : index
    %28 = memref.load %arg2[%c1_16, %c1_17] : memref<2x3xf32, #tpu.memory_space<smem>>
    %29 = vector.broadcast %28 : f32 to vector<8x16xf32>
    %30 = arith.addf %27, %29 : vector<8x16xf32>
    %cst_18 = arith.constant 0.000000e+00 : f32
    %31 = vector.broadcast %cst_18 : f32 to vector<8x16xf32>
    %32 = arith.maximumf %30, %31 : vector<8x16xf32>
    %33 = vector.shape_cast %32 : vector<8x16xf32> to vector<8x2x8xf32>
    %34 = tpu.transpose %33, [0, 2, 1] : vector<8x2x8xf32> -> vector<8x8x2xf32>
    %35 = vector.shape_cast %34 : vector<8x8x2xf32> to vector<64x2xf32>
    %36 = vector.extract_strided_slice %0 {offsets = [0, 64], sizes = [3, 64], strides = [1, 1]} : vector<3x192xf32> to vector<3x64xf32>
    %cst_19 = arith.constant dense<0.000000e+00> : vector<3x2xf32>
    %37 = tpu.matmul %36, %35, %cst_19 {dimension_numbers = #tpu.dot_dimension_numbers<[1], [0], [0], [1], [0, 0, 1, 1], [], []>, precision = #tpu.contract_precision<fp32>} : vector<3x64xf32>, vector<64x2xf32>, vector<3x2xf32> -> vector<3x2xf32>
    %38 = arith.addf %21, %37 : vector<3x2xf32>
    %c0_20 = arith.constant 0 : index
    %c2 = arith.constant 2 : index
    %39 = arith.index_cast %3 : i32 to index
    %c0_21 = arith.constant 0 : index
    %40 = vector.load %arg3[%c0_20, %c2, %39, %c0_21] : memref<1x3x8x16xf32, #tpu.memory_space<vmem>>, vector<1x1x8x16xf32>
    %41 = vector.shape_cast %40 : vector<1x1x8x16xf32> to vector<8x16xf32>
    %c0_22 = arith.constant 0 : index
    %c2_23 = arith.constant 2 : index
    %42 = memref.load %arg2[%c0_22, %c2_23] : memref<2x3xf32, #tpu.memory_space<smem>>
    %43 = vector.broadcast %42 : f32 to vector<8x16xf32>
    %44 = arith.mulf %41, %43 : vector<8x16xf32>
    %c1_24 = arith.constant 1 : index
    %c2_25 = arith.constant 2 : index
    %45 = memref.load %arg2[%c1_24, %c2_25] : memref<2x3xf32, #tpu.memory_space<smem>>
    %46 = vector.broadcast %45 : f32 to vector<8x16xf32>
    %47 = arith.addf %44, %46 : vector<8x16xf32>
    %cst_26 = arith.constant 0.000000e+00 : f32
    %48 = vector.broadcast %cst_26 : f32 to vector<8x16xf32>
    %49 = arith.maximumf %47, %48 : vector<8x16xf32>
    %50 = vector.shape_cast %49 : vector<8x16xf32> to vector<8x2x8xf32>
    %51 = tpu.transpose %50, [0, 2, 1] : vector<8x2x8xf32> -> vector<8x8x2xf32>
    %52 = vector.shape_cast %51 : vector<8x8x2xf32> to vector<64x2xf32>
    %53 = vector.extract_strided_slice %0 {offsets = [0, 128], sizes = [3, 64], strides = [1, 1]} : vector<3x192xf32> to vector<3x64xf32>
    %cst_27 = arith.constant dense<0.000000e+00> : vector<3x2xf32>
    %54 = tpu.matmul %53, %52, %cst_27 {dimension_numbers = #tpu.dot_dimension_numbers<[1], [0], [0], [1], [0, 0, 1, 1], [], []>, precision = #tpu.contract_precision<fp32>} : vector<3x64xf32>, vector<64x2xf32>, vector<3x2xf32> -> vector<3x2xf32>
    %55 = arith.addf %38, %54 : vector<3x2xf32>
    %56 = vector.broadcast %1 : vector<3x1xf32> to vector<3x2xf32>
    %57 = arith.addf %55, %56 : vector<3x2xf32>
    %58 = math.tanh %57 : vector<3x2xf32>
    %cst_28 = arith.constant 1.000000e+00 : f32
    %59 = vector.broadcast %cst_28 : f32 to vector<3x2xf32>
    %60 = arith.addf %58, %59 : vector<3x2xf32>
    %cst_29 = arith.constant 5.000000e-01 : f32
    %61 = vector.broadcast %cst_29 : f32 to vector<3x2xf32>
    %62 = arith.mulf %60, %61 : vector<3x2xf32>
    %c0_30 = arith.constant 0 : index
    %63 = arith.index_cast %c0_i32 : i32 to index
    %c0_31 = arith.constant 0 : index
    %c0_32 = arith.constant 0 : index
    %64 = vector.load %arg6[%c0_30, %63, %c0_31, %c0_32] : memref<1x1x3x2xf32, #tpu.memory_space<vmem>>, vector<1x1x3x2xf32>
    %65 = vector.shape_cast %64 : vector<1x1x3x2xf32> to vector<3x2xf32>
    %66 = vector.shape_cast %62 : vector<3x2xf32> to vector<1x1x3x2xf32>
    tpu.vector_store %arg6[%c0_30, %63, %c0_31, %c0_32], %66 {strides = array<i32>} : memref<1x1x3x2xf32, #tpu.memory_space<vmem>>, vector<1x1x3x2xf32>,
    %c1_i32 = arith.constant 1 : i32
    return
  }
  func.func @transform_0(%arg0: i32, %arg1: i32) -> (i32, i32) {
    %c0_i32 = arith.constant 0 : i32
    %c0_i32_0 = arith.constant 0 : i32
    %c0_i32_1 = arith.constant 0 : i32
    return %c0_i32, %c0_i32_0 : i32, i32
  }
  func.func @transform_1(%arg0: i32, %arg1: i32) -> (i32, i32, i32, i32) {
    %c0_i32 = arith.constant 0 : i32
    %c0_i32_0 = arith.constant 0 : i32
    %c0_i32_1 = arith.constant 0 : i32
    return %arg0, %c0_i32, %arg1, %c0_i32_0 : i32, i32, i32, i32
  }
  func.func @transform_2(%arg0: i32, %arg1: i32) -> (i32, i32) {
    %c0_i32 = arith.constant 0 : i32
    %c0_i32_0 = arith.constant 0 : i32
    %c0_i32_1 = arith.constant 0 : i32
    return %c0_i32, %c0_i32_0 : i32, i32
  }
  func.func @transform_3(%arg0: i32, %arg1: i32) -> (i32, i32) {
    %c0_i32 = arith.constant 0 : i32
    %c0_i32_0 = arith.constant 0 : i32
    %c0_i32_1 = arith.constant 0 : i32
    return %c0_i32, %c0_i32_0 : i32, i32
  }
  func.func @transform_4(%arg0: i32, %arg1: i32) -> (i32, i32, i32, i32) {
    %c0_i32 = arith.constant 0 : i32
    %c0_i32_0 = arith.constant 0 : i32
    %c0_i32_1 = arith.constant 0 : i32
    return %arg0, %arg1, %c0_i32, %c0_i32_0 : i32, i32, i32, i32
  }
}

</mosaic_0001>

<bundles_post_ra>
// kernel: context_extractor.1
= control target key start
LH: loop header
LB: loop body
LE: loop exit
PB: predicated region body
PF: predicated region fallthrough
CT: control target
= control target key end

     0   :  { %9 = vsyncpa [#allocation3], 0  ;;  %s2291_s15 = smov 0   ;;  %s2293_s16 = smov 0   ;;  %s2881_s0 = inlined_call_operand.vmem [shape: f32[2,3], index: 0, kind: input, shape index: {}]   ;;  %s2882_s1 = inlined_call_operand.vmem [shape: f32[2,3,16,16], index: 1, kind: input, shape index: {}]   ;;  %s2883_s2 = inlined_call_operand.vmem [shape: f32[3,192], index: 2, kind: input, shape index: {}]   ;;  %s2884_s3 = inlined_call_operand.vmem [shape: f32[3,1], index: 3, kind: input, shape index: {}]   ;;  %s2885_s4 = inlined_call_operand.vmem [shape: f32[2,2,3,2], index: 4, kind: output, shape index: {}]  }
   0x1   :  { %s2295_s17 = smov 0   ;;  %s2297_s18 = smov 0  }
   0x2   :  { %s2299_s19 = smov 0   ;;  %s2301_s20 = smov 0  }
   0x3   :  { %s2303_s21 = smov 0  }
   0x4 LB: > { %s2086_s22 = sadd.s32 4294967295, %s2258_s21   ;;  %s24_s23 = sadd.s32 1, %s2250_s19  ;;  %s2258_s21 = sphi %s2303_s21, %s15_s21   ;;  %s2254_s20 = sphi %s2301_s20, %s2894_s20   ;;  %s2250_s19 = sphi %s2299_s19, %s2893_s19   ;;  %s2246_s18 = sphi %s2297_s18, %s2892_s18   ;;  %s2242_s17 = sphi %s2295_s17, %s2891_s17   ;;  %s2238_s16 = sphi %s2293_s16, %s2890_s16   ;;  %s2234_s15 = sphi %s2291_s15, %s2889_s15  }
   0x5   : > { %p25_p0 = scmp.ge.s32.totalorder %s24_s23, 2  ;;  %s27_s24 = sadd.s32 1, %s2254_s20 }
   0x6   : > { %s57_s25 = sadd.s32 1, %s2238_s16  ;;  %p64_p1 = scmp.ne.s32.totalorder %s2238_s16, %s2234_s15 }
   0x7   : > { %s2896_s23 = smov (%p25_p0, %s24_s23), 0  ;;  %s2898_s24 = smov (!%p25_p0, %s27_s24), %s2254_s20 }
   0x8   : > { %s53_s26 = ssub.s32 %s2250_s19, %s2896_s23  ;;  %p65_p2 = scmp.eq.s32.totalorder %s2258_s21, 0 }
   0x9   : > { %p29_p3 = scmp.ge.s32.totalorder %s2898_s24, 2  ;;  %p2088_p4 = scmp.ge.s32.totalorder %s2258_s21, 1 }
   0xa   : > { %p2339_p5 = por %p65_p2, %p64_p1  ;;  %p151_p6 = scmp.lt.s32.totalorder %s2258_s21, 5 }
   0xb   : > { %s2900_s24 = smov (%p29_p3, %s2898_s24), 0  ;;  %p2352_p8 = scmp.eq.s32.totalorder %s2086_s22, 0 }
   0xc   : > { %p2346_p7 = pnand %p2088_p4, %p151_p6  ;;  %s52_s29 = ssub.s32 %s2254_s20, %s2900_s24 }
   0xd   : > { %s54_s5 = sor.u32 %s53_s26, %s52_s29  ;;  %s163_s8 = sshll.u32 %s2881_s0, 4  ;;  %s164_s8 = int_to_ptr.vmem [resolvable:$true] %s163_s8 }
   0xe   : > { %p2112_p9 = pneg %p2346_p7  ;;  %p55_p10 = scmp.eq.s32.totalorder %s54_s5, 0 }
   0xf   : > { %s2260_s10 = smov [#allocation2]   ;;  %p2090_p12 = scmp.ge.s32.totalorder %s2258_s21, 4 }
  0x10   : > { %p2113_p11 = pnand %p2352_p8, %p2112_p9 }
  0x11   : > { %s2364_s9 = scalar_select %p55_p10, %s2238_s16, %s57_s25  }
  0x12   : > { %2115 = dma.vmem_to_smem (!%p2113_p11), %s164_s8, 32, %s2260_s10, [#allocation3]  }
  0x13   : > { %176 = sbr.rel (%p2090_p12) target bundleno = 34 (0x22), region = 28 }
  0x18   : > { %179 = sbr.rel (!%p2339_p5) target bundleno = 34 (0x22), region = 32  ;;  %s181_s11 = sand.u32 (%p2339_p5), 1, %s2238_s16  }
  0x19   : > { %s2106_s12 = smul.u32 (%p2339_p5), 6, %s2254_s20 }
  0x1a   : > { %s2105_s13 = smul.u32 (%p2339_p5), 24, %s181_s11 }
  0x1b   : > { %s185_s14 = sadd.s32 (%p2339_p5), %s2250_s19, %s2106_s12 }
  0x1c   : > { %s2091_s22 = sshll.u32 (%p2339_p5), %s185_s14, 3  ;;  %s183_s5 = scalar_lea.vmem (%p2339_p5), [#allocation4], %s2105_s13 }
  0x1d   : > { %s187_s25 = scalar_lea.vmem %s2882_s1, %s2091_s22 }
  0x1e   : > { %v220_v0 = vld [vmem:[%s187_s25] sm:$0xff]  ;;  %v222_v1 = vld [vmem:[%s187_s25 + $0x10] sm:$0xff] }
  0x1f   : > { %v224_v2 = vld [vmem:[%s187_s25 + $0x20] sm:$0xff]  ;;  %221 = vst [vmem:[%s183_s5] sm:$0xff] %v220_v0 }
  0x20   : > { %223 = vst [vmem:[%s183_s5 + $0x8] sm:$0xff] %v222_v1 }
  0x21   : > { %225 = vst [vmem:[%s183_s5 + $0x10] sm:$0xff] %v224_v2 }
  0x22 PF: > { %234 = sbr.rel (%p2346_p7) target bundleno = 619 (0x26b), region = 70 }
  0x27   : > { %2229 = dma.done.wait (%p2352_p8), [#allocation3], 32  }
  0x28   : > { %2231 = vsyncadd (%p2352_p8), [#allocation3], 4294967264  ;;  %s242_s27 = sand.u32 1, %s2234_s15  }
  0x29   : > { %s2107_s6 = smul.u32 24, %s242_s27 }
  0x2b   : > { %s244_s7 = scalar_lea.vmem [#allocation4], %s2107_s6 }
  0x2c   : > { %248 = sfence }
  0x2d   : > { %s2098_s8 = sld [smem:[#allocation2 + $0x1]]  ;;  %v2385_v3 = vld [vmem:[%s2883_s2] sm:$0x77]  ;;  %v2097_v4 = vld [vmem:[%s244_s7 + $0x8] sm:$0xff]  ;;  %v2100_v10 = vld [vmem:[%s244_s7 + $0x10] sm:$0xff]  ;;  %s2261_s15 = smov 64  }
  0x2e   : > { %s2099_s10 = sld [smem:[#allocation2 + $0x81]]  ;;  %925 = vst [vmem:[#allocation1] ss:$2 sm:$0xff] %v2385_v3  ;;  %v281_v6 = vld [vmem:[%s244_s7] sm:$0xff]  ;;  %s2262_s22 = smov 120   ;;  %vm294_vm0 = vcmask 1047556  }
  0x2f   : > { %s282_s28 = sld [smem:[#allocation2]]  ;;  %v2263_v23 = vmov 1983009808   ;;  %v2264_v28 = vmov 1934713408   ;;  %vm929_vm1 = vcmask 523264  }
  0x30   : > { %s2096_s13 = sld [smem:[#allocation2 + $0x80]]  ;;  %v297_v24 = vunpack.c.l.s4 %v2263_v23  ;;  %v319_v29 = vunpack.c.l.s4 %v2264_v28  ;;  %p271_p13 = scmp.lt.s32.totalorder %s2246_s18, 1  ;;  %vm1981_vm2 = vcmask 10240  }
  0x31   : > { %s2101_s14 = sld [smem:[#allocation2 + $0x2]]  ;;  %p273_p0 = scmp.lt.s32.totalorder %s2242_s17, 1 }
  0x32   : > { %s2102_s30 = sld [smem:[#allocation2 + $0x82]]  ;;  %v2392_v25 = vunpack.c.0.s8 %v297_v24  ;;  %v2399_v34 = vunpack.c.0.s8 %v319_v29  ;;  %s2902_s18 = smov (!%p271_p13, %s2246_s18), 1 }
  0x33   : > { %v606_v5 = vstv %s2098_s8  ;;  %s2904_s17 = smov (!%p273_p0, %s2242_s17), 1  ;;  %s2094_s25 = sshll.u32 %s2902_s18, 1 }
  0x34   : > { %v607_v7 = vmul.f32 %v2097_v4, %v606_v5  ;;  %v609_v8 = vstv %s2099_s10  ;;  %s276_s5 = sadd.s32 %s2094_s25, %s2904_s17 }
  0x35   : > { %v283_v9 = vstv %s282_s28  ;;  %v926_v13 = vld.sshfl [vmem:[#allocation1] sm:$0xff pattern:$0x75316420]  ;;  %s2095_s27 = sshll.u32 %s276_s5, 2 }
  0x36   : > { %v610_v11 = vadd.f32 %v609_v8, %v607_v7  ;;  %v284_v12 = vmul.f32 %v283_v9, %v281_v6  ;;  %v286_v14 = vstv %s2096_s13  ;;  %927 = vrot.lane.b32.xlu1 %v926_v13, %s2261_s15  ;;  %1730 = vst [vmem:[#allocation1] ss:$2 sm:$0xff] %v2385_v3  ;;  %s278_s8 = scalar_lea.vmem %s2885_s4, %s2095_s27 }
  0x37   : > { %v1412_v15 = vstv %s2101_s14 }
  0x38   : > { %v611_v16 = vmax.f32 %v610_v11, 0.0  ;;  %v1413_v17 = vmul.f32 %v2100_v10, %v1412_v15  ;;  %v1415_v18 = vstv %s2102_s30  ;;  %v287_v19 = vadd.f32 %v286_v14, %v284_v12 }
  0x3a   : > { %613 = vrot.lane.b32.xlu0 %v611_v16, %s2262_s22  ;;  %v1416_v20 = vadd.f32 %v1415_v18, %v1413_v17  ;;  %v288_v22 = vmax.f32 %v287_v19, 0.0  ;;  %v616_v26 = vrot.slane %v611_v16, 4  ;;  %v2395_v27 = vperm.slane %v611_v16, %v2392_v25 }
  0x3c   : > { %v2389_v21 = vmax.f32 %v1416_v20, 0.0  ;;  %v617_v30 = vsel %vm294_vm0, 0.0, %v616_v26  ;;  %v293_v31 = vrot.slane %v288_v22, 4  ;;  %v638_v32 = vrot.slane %v2395_v27, 4 }
  0x3d   : > { %v625_v37 = vperm.slane %v617_v30, %v2392_v25  ;;  %v299_v39 = vperm.slane %v288_v22, %v2392_v25 }
  0x3e   : > { %1419 = vrot.lane.b32.xlu1 %v2389_v21, %s2262_s22  ;;  %v295_v38 = vsel %vm294_vm0, 0.0, %v293_v31  ;;  %v1422_v7 = vrot.slane %v2389_v21, 4  ;;  %v1427_v23 = vperm.slane %v2389_v21, %v2392_v25 }
  0x3f   : > { %v650_v44 = vrot.slane %v625_v37, 4  ;;  %v303_v45 = vperm.slane %v295_v38, %v2392_v25  ;;  %v316_v46 = vrot.slane %v299_v39, 4 }
  0x40   : > { %v1423_v16 = vsel %vm294_vm0, 0.0, %v1422_v7 }
  0x41   : > { %v328_v51 = vrot.slane %v303_v45, 4  ;;  %v1431_v18 = vperm.slane %v1423_v16, %v2392_v25 }
  0x42   : > { %290 = vrot.lane.b32.xlu0 %v288_v22, %s2262_s22 }
  0x43   : > { %v1456_v22 = vrot.slane %v1431_v18, 4 }
  0xa8   : > { %v2424_v61 = vpop.permute.xlu1 %927 }
  0xac   : > { %v614_v33 = vpop.permute.xlu0 %613 }
  0xad   : > { %v626_v35 = vrot.slane %v614_v33, 4  ;;  %v2402_v36 = vperm.slane %v614_v33, %v2392_v25 }
  0xaf   : > { %v627_v40 = vsel %vm294_vm0, 0.0, %v626_v35  ;;  %v639_v41 = vsel %vm294_vm0, %v2402_v36, %v638_v32  ;;  %v636_v26 = vrot.slane %v2402_v36, 4  ;;  %v1444_v32 = vrot.slane %v1427_v23, 4 }
  0xb0   : > { %v647_v42 = vperm.slane %v639_v41, %v2399_v34  ;;  %v635_v43 = vperm.slane %v627_v40, %v2392_v25  ;;  %v1420_v10 = vpop.permute.xlu1 %1419 }
  0xb1   : > { %v1432_v12 = vrot.slane %v1420_v10, 4  ;;  %v1437_v29 = vperm.slane %v1420_v10, %v2392_v25  ;;  %v637_v33 = vsel %vm294_vm0, %v636_v26, %v2395_v27 }
  0xb2   : > { %732 = vxpose.xlu2.b32.start.end [1/1] (short) (narrow) %v647_v42, 8  ;;  %v651_v50 = vsel %vm294_vm0, %v635_v43, %v650_v44  ;;  %v648_v1 = vrot.slane %v635_v43, 4  ;;  %v662_v14 = vrot.slane %v647_v42, 4  ;;  %v643_v36 = vperm.slane %v637_v33, %v2399_v34 }
  0xb3   : > { %v2419_v56 = vperm.slane %v651_v50, %v2399_v34  ;;  %v1433_v15 = vsel %vm294_vm0, 0.0, %v1432_v12  ;;  %v1445_v21 = vsel %vm294_vm0, %v1437_v29, %v1444_v32 }
  0xb4   : > { %v291_v47 = vpop.permute.xlu0 %290  ;;  %v649_v9 = vsel %vm294_vm0, %v648_v1, %v625_v37  ;;  %v1441_v17 = vperm.slane %v1433_v15, %v2392_v25  ;;  %v663_v24 = vsel %vm294_vm0, 0.0, %v662_v14  ;;  %v1453_v35 = vperm.slane %v1445_v21, %v2399_v34 }
  0xb5   : > { %v304_v48 = vrot.slane %v291_v47, 4  ;;  %v309_v49 = vperm.slane %v291_v47, %v2392_v25  ;;  %v655_v13 = vperm.slane %v649_v9, %v2399_v34 }
  0xb6   : > { %v1457_v28 = vsel %vm294_vm0, %v1441_v17, %v1456_v22  ;;  %v1468_v37 = vrot.slane %v1453_v35, 4  ;;  %v1454_v27 = vrot.slane %v1441_v17, 4 }
  0xb7   : > { %v305_v52 = vsel %vm294_vm0, 0.0, %v304_v48  ;;  %v317_v53 = vsel %vm294_vm0, %v309_v49, %v316_v46  ;;  %v314_v55 = vrot.slane %v309_v49, 4  ;;  %v664_v20 = vrot.slane %v655_v13, 4 }
  0xb8   : > { %v313_v54 = vperm.slane %v305_v52, %v2392_v25  ;;  %v325_v57 = vperm.slane %v317_v53, %v2399_v34  ;;  %v1465_v31 = vperm.slane %v1457_v28, %v2399_v34  ;;  %v660_v25 = vrot.slane %v643_v36, 4 }
  0xb9   : > { %v315_v0 = vsel %vm294_vm0, %v314_v55, %v299_v39  ;;  %v665_v30 = vsel %vm294_vm0, 0.0, %v664_v20  ;;  %v1469_v38 = vsel %vm294_vm0, 0.0, %v1468_v37  ;;  %v1442_v39 = vrot.slane %v1437_v29, 4 }
  0xba   : > { %v326_v58 = vrot.slane %v313_v54, 4  ;;  %860 = vxpose.xlu2.b32.start.end [1/1] (short) (narrow) %v2419_v56, 8  ;;  %v340_v59 = vrot.slane %v325_v57, 4  ;;  %v329_v60 = vsel %vm294_vm0, %v313_v54, %v328_v51  ;;  %v2432_v6 = vperm.slane %v315_v0, %v2399_v34 }
  0xbb   : > { %v337_v62 = vperm.slane %v329_v60, %v2399_v34  ;;  %v1472_v40 = vrot.slane %v1465_v31, 4  ;;  %v661_v41 = vsel %vm294_vm0, 0.0, %v660_v25  ;;  %v1443_v43 = vsel %vm294_vm0, %v1442_v39, %v1427_v23 }
  0xbc   : > { %v341_v63 = vsel %vm294_vm0, 0.0, %v340_v59  ;;  %v327_v4 = vsel %vm294_vm0, %v326_v58, %v303_v45  ;;  %v338_v11 = vrot.slane %v2432_v6, 4  ;;  %v1449_v44 = vperm.slane %v1443_v43, %v2399_v34 }
  0xbd   : > { %442 = vxpose.xlu0.b32.start.end [1/1] (short) (narrow) %v341_v63, 8  ;;  %v344_v2 = vrot.slane %v337_v62, 4  ;;  %v333_v8 = vperm.slane %v327_v4, %v2399_v34  ;;  %v1473_v42 = vsel %vm294_vm0, 0.0, %v1472_v40  ;;  %v666_v45 = vrot.slane %v2419_v56, 4 }
  0xbe   : > { %v339_v19 = vsel %vm294_vm0, 0.0, %v338_v11  ;;  %v1455_v46 = vsel %vm294_vm0, %v1454_v27, %v1431_v18  ;;  %v1466_v49 = vrot.slane %v1449_v44, 4  ;;  %v930_v4 = vsel %vm929_vm1, %v2424_v61, 0 }
  0xbf   : > { %v345_v5 = vsel %vm294_vm0, 0.0, %v344_v2  ;;  %v667_v47 = vsel %vm294_vm0, 0.0, %v666_v45  ;;  %v1461_v48 = vperm.slane %v1455_v46, %v2399_v34  ;;  %v342_v51 = vrot.slane %v333_v8, 4 }
  0xc0   : > { %570 = vxpose.xlu1.b32.start.end [1/1] (short) (narrow) %v345_v5, 8  ;;  %v1467_v50 = vsel %vm294_vm0, 0.0, %v1466_v49  ;;  %v2487_v9 = vand.u32 4294901760, %v930_v4 }
  0xc1   : > { %v343_v52 = vsel %vm294_vm0, 0.0, %v342_v51  ;;  %v1470_v53 = vrot.slane %v1461_v48, 4 }
  0xc2   : > { %538 = vxpose.xlu2.b32.start.end [1/1] (short) (narrow) %v337_v62, 8  ;;  %v2509_v16 = vsub.f32 %v930_v4, %v2487_v9 }
  0xc3   : > { %v1471_v54 = vsel %vm294_vm0, 0.0, %v1470_v53 }
  0xc4   : > { %v958_v21 = vand.u32 4294901760, %v2509_v16 }
  0xc5   : > { %474 = vxpose.xlu0.b32.start.end [1/1] (short) (narrow) %v333_v8, 8 }
  0xc6   : > { %v959_v27 = vsub.f32 %v2509_v16, %v958_v21 }
  0xc8   : > { %378 = vxpose.xlu1.b32.start.end [1/1] (short) (narrow) %v339_v19, 8 }
  0xca   : > { %764 = vxpose.xlu2.b32.start.end [1/1] (short) (narrow) %v663_v24, 8 }
  0xcd   : > { %828 = vxpose.xlu0.b32.start.end [1/1] (short) (narrow) %v665_v30, 8 }
  0xd0   : > { %1666 = vxpose.xlu1.b32.start.end [1/1] (short) (narrow) %v1465_v31, 8 }
  0xd2   : > { %796 = vxpose.xlu2.b32.start.end [1/1] (short) (narrow) %v655_v13, 8 }
  0xd5   : > { %410 = vxpose.xlu0.b32.start.end [1/1] (short) (narrow) %v325_v57, 8 }
  0xd8   : > { %1570 = vxpose.xlu1.b32.start.end [1/1] (short) (narrow) %v1469_v38, 8 }
  0xda   : > { %700 = vxpose.xlu2.b32.start.end [1/1] (short) (narrow) %v661_v41, 8 }
  0xdd   : > { %1698 = vxpose.xlu0.b32.start.end [1/1] (short) (narrow) %v1473_v42, 8 }
  0xe0   : > { %1474 = vxpose.xlu1.b32.start.end [1/1] (short) (narrow) %v1449_v44, 8 }
  0xe2   : > { %892 = vxpose.xlu2.b32.start.end [1/1] (short) (narrow) %v667_v47, 8 }
  0xe5   : > { %1602 = vxpose.xlu0.b32.start.end [1/1] (short) (narrow) %v1461_v48, 8 }
  0xea   : > { %668 = vxpose.xlu2.b32.start.end [1/1] (short) (narrow) %v643_v36, 8 }
  0xed   : > { %1506 = vxpose.xlu0.b32.start.end [1/1] (short) (narrow) %v1467_v50, 8 }
  0xf2   : > { %506 = vxpose.xlu2.b32.start.end [1/1] (short) (narrow) %v343_v52, 8 }
  0xfa   : > { %346 = vxpose.xlu2.b32.start.end [1/1] (short) (narrow) %v2432_v6, 8 }
 0x102   : > { %1634 = vxpose.xlu2.b32.start.end [1/1] (short) (narrow) %v1471_v54, 8 }
 0x10a   : > { %1538 = vxpose.xlu2.b32.start.end [1/1] (short) (narrow) %v1453_v35, 8 }
 0x14b   : > { %v748_v55 = vpop.trf.xlu2 }
 0x14c   : > { %v2517_v20 = vand.u32 4294901760, %v748_v55 }
 0x14e   : > { %v2546_v35 = vsub.f32 %v748_v55, %v2517_v20  ;;  %v1169_v55 = vsel %vm929_vm1, %v2385_v3, 0 }
 0x150   : > { %v1005_v46 = vand.u32 4294901760, %v2546_v35 }
 0x152   : > { %v1006_v3 = vsub.f32 %v2546_v35, %v1005_v46 }
 0x153   : > { %v876_v34 = vpop.trf.xlu2 }
 0x154   : > { %v2474_v0 = vand.u32 4294901760, %v876_v34 }
 0x156   : > { %v2481_v5 = vsub.f32 %v876_v34, %v2474_v0 }
 0x158   : > { %v981_v14 = vand.u32 4294901760, %v2481_v5 }
 0x15a   : > { %v982_v24 = vsub.f32 %v2481_v5, %v981_v14 }
 0x15b   : > { %v554_v56 = vpop.trf.xlu2 }
 0x15c   : > { %v2511_v17 = vand.u32 4294901760, %v554_v56  ;;  %v983_v37 = vand.u32 4294901760, %v982_v24 }
 0x15e   : > { %v2537_v31 = vsub.f32 %v554_v56, %v2511_v17  ;;  %v960_v56 = vand.u32 4294901760, %v959_v27 }
 0x160   : > { %v1220_v42 = vand.u32 4294901760, %v2537_v31 }
 0x161   : > { %v2470_v57 = vpop.trf.xlu0 }
 0x162   : > { %v2581_v50 = vand.u32 4294901760, %v2470_v57 }
 0x163   : > { %v780_v58 = vpop.trf.xlu2 }
 0x164   : > { %v586_v2 = vpop.trf.xlu1  ;;  %v2494_v12 = vand.u32 4294901760, %v780_v58 }
 0x165   : > { %v2485_v8 = vand.u32 4294901760, %v586_v2 }
 0x166   : > { %v2521_v22 = vsub.f32 %v780_v58, %v2494_v12  ;;  %v1221_v58 = vsub.f32 %v2537_v31, %v1220_v42 }
 0x167   : > { %v2506_v15 = vsub.f32 %v586_v2, %v2485_v8 }
 0x168   : > { %v999_v38 = vand.u32 4294901760, %v2521_v22 }
 0x169   : > { %v2472_v60 = vpop.trf.xlu0  ;;  %v1214_v30 = vand.u32 4294901760, %v2506_v15 }
 0x16a   : > { %v2568_v44 = vand.u32 4294901760, %v2472_v60  ;;  %v1000_v48 = vsub.f32 %v2521_v22, %v999_v38 }
 0x16b   : > { %v812_v59 = vpop.trf.xlu2  ;;  %v1215_v40 = vsub.f32 %v2506_v15, %v1214_v30 }
 0x16c   : > { %v2483_v6 = vand.u32 4294901760, %v812_v59  ;;  %v394_v49 = vpop.trf.xlu1  ;;  %v1001_v4 = vand.u32 4294901760, %v1000_v48 }
 0x16d   : > { %v1216_v52 = vand.u32 4294901760, %v1215_v40 }
 0x16e   : > { %v2497_v13 = vsub.f32 %v812_v59, %v2483_v6  ;;  %v2598_v59 = vsub.f32 %v2472_v60, %v2568_v44  ;;  %v2611_v60 = vand.u32 4294901760, %v1169_v55 }
 0x170   : > { %v993_v26 = vand.u32 4294901760, %v2497_v13 }
 0x171   : > { %v844_v63 = vpop.trf.xlu0 }
 0x172   : > { %v2476_v1 = vand.u32 4294901760, %v844_v63  ;;  %v994_v25 = vsub.f32 %v2497_v13, %v993_v26 }
 0x173   : > { %v716_v62 = vpop.trf.xlu2 }
 0x174   : > { %v2492_v11 = vsub.f32 %v844_v63, %v2476_v1  ;;  %v2532_v28 = vand.u32 4294901760, %v716_v62  ;;  %v995_v47 = vand.u32 4294901760, %v994_v25 }
 0x176   : > { %v987_v19 = vand.u32 4294901760, %v2492_v11  ;;  %v2557_v39 = vsub.f32 %v716_v62, %v2532_v28  ;;  %v2605_v62 = vand.u32 4294901760, %v394_v49 }
 0x178   : > { %v988_v33 = vsub.f32 %v2492_v11, %v987_v19  ;;  %v1011_v54 = vand.u32 4294901760, %v2557_v39 }
 0x179   : > { %v426_v43 = vpop.trf.xlu0 }
 0x17a   : > { %v989_v41 = vand.u32 4294901760, %v988_v33  ;;  %v2585_v53 = vand.u32 4294901760, %v426_v43  ;;  %v1012_v24 = vsub.f32 %v2557_v39, %v1011_v54  ;;  %v1232_v33 = vand.u32 4294901760, %v2598_v59 }
 0x17b   : > { %v908_v7 = vpop.trf.xlu2 }
 0x17c   : > { %v2489_v10 = vand.u32 4294901760, %v908_v7 }
 0x17e   : > { %v2500_v61 = vsub.f32 %v908_v7, %v2489_v10  ;;  %941 = vmatpush.msra.mxu0 %v2489_v10  ;;  %1073 = vmatpush.msra.mxu3 %v2489_v10  ;;  %v2615_v7 = vsub.f32 %v2470_v57, %v2581_v50  ;;  %v1007_v57 = vand.u32 4294901760, %v1006_v3 }
 0x180   : > { %943 = vmatpush.msra.mxu0 %v2474_v0  ;;  %1036 = vmatpush.msra.mxu2 %v2500_v61  ;;  %v975_v18 = vand.u32 4294901760, %v2500_v61 }
 0x181   : > { %1075 = vmatpush.msra.mxu3 %v2474_v0 }
 0x182   : > { %945 = vmatpush.msra.mxu0 %v2476_v1  ;;  %1039 = vmatpush.msra.mxu2 %v2481_v5  ;;  %v976_v23 = vsub.f32 %v2500_v61, %v975_v18  ;;  %v2631_v61 = vsub.f32 %v394_v49, %v2605_v62  ;;  %v2642_v5 = vsub.f32 %v1169_v55, %v2611_v60 }
 0x183   : > { %1077 = vmatpush.msra.mxu3 %v2476_v1  ;;  %v684_v29 = vpop.trf.xlu2 }
 0x184   : > { %947 = vmatpush.msra.mxu0 %v2483_v6  ;;  %1042 = vmatpush.msra.mxu2 %v2492_v11  ;;  %v977_v32 = vand.u32 4294901760, %v976_v23  ;;  %v2548_v36 = vand.u32 4294901760, %v684_v29  ;;  %v2620_v23 = vsub.f32 %v426_v43, %v2585_v53  ;;  %v1233_v11 = vsub.f32 %v2598_v59, %v1232_v33 }
 0x185   : > { %1079 = vmatpush.msra.mxu3 %v2483_v6 }
 0x186   : > { %949 = vmatpush.msra.mxu0 %v2494_v12  ;;  %978 = vmatpush.msra.mxu1 %v977_v32  ;;  %v2571_v45 = vsub.f32 %v684_v29, %v2548_v36  ;;  %v1222_v29 = vand.u32 4294901760, %v1221_v58  ;;  %v1244_v25 = vand.u32 4294901760, %v2620_v23 }
 0x187   : > { %1045 = vmatpush.msra.mxu2 %v2497_v13  ;;  %1081 = vmatpush.msra.mxu3 %v2494_v12 }
 0x188   : > { %951 = vmatpush.msra.mxu0 %v2517_v20  ;;  %984 = vmatpush.msra.mxu1 %v983_v37  ;;  %v1017_v63 = vand.u32 4294901760, %v2571_v45  ;;  %v1238_v37 = vand.u32 4294901760, %v2615_v7 }
 0x189   : > { %1048 = vmatpush.msra.mxu2 %v2521_v22  ;;  %1083 = vmatpush.msra.mxu3 %v2517_v20  ;;  %v1234_v22 = vand.u32 4294901760, %v1233_v11 }
 0x18a   : > { %953 = vmatpush.msra.mxu0 %v2532_v28  ;;  %990 = vmatpush.msra.mxu1 %v989_v41  ;;  %v1239_v13 = vsub.f32 %v2615_v7, %v1238_v37 }
 0x18b   : > { %1051 = vmatpush.msra.mxu2 %v2546_v35  ;;  %1085 = vmatpush.msra.mxu3 %v2532_v28  ;;  %v522_v51 = vpop.trf.xlu2 }
 0x18c   : > { %v2590_v34 = vand.u32 4294901760, %v522_v51  ;;  %955 = vmatpush.msra.mxu0 %v2548_v36  ;;  %996 = vmatpush.msra.mxu1 %v995_v47  ;;  %v1197_v47 = vand.u32 4294901760, %v2642_v5 }
 0x18d   : > { %1054 = vmatpush.msra.mxu2 %v2557_v39  ;;  %1087 = vmatpush.msra.mxu3 %v2548_v36 }
 0x18e   : > { %v2609_v2 = vsub.f32 %v522_v51, %v2590_v34  ;;  %961 = vmatmul.f32.vlgmr.msra.gmra.mxu0 %v960_v56  ;;  %1091 = vmatmul.f32.vlgmr.msra.gmra.mxu3 %v958_v21  ;;  %v1198_v35 = vsub.f32 %v2642_v5, %v1197_v47 }
 0x18f   : > { %1106 = vmatpush.msrb.mxu0 %v975_v18  ;;  %1217 = vmatpush.msrb.mxu3 %v1216_v52  ;;  %v1018_v18 = vsub.f32 %v2571_v45, %v1017_v63 }
 0x190   : > { %1002 = vmatpush.msra.mxu1 %v1001_v4  ;;  %1057 = vmatpush.msra.mxu2 %v2571_v45  ;;  %v1226_v32 = vand.u32 4294901760, %v2609_v2  ;;  %v1682_v45 = vpop.trf.xlu1 }
 0x191   : > { %1060 = vmatmul.f32.vlgmr.msra.gmra.mxu2 %v2509_v16  ;;  %1110 = vmatpush.msrb.mxu0 %v981_v14  ;;  %v1013_v14 = vand.u32 4294901760, %v1012_v24  ;;  %v1019_v27 = vand.u32 4294901760, %v1018_v18 }
 0x192   : > { %1180 = vmatpush.msrb.mxu2 %v2485_v8  ;;  %1223 = vmatpush.msrb.mxu3 %v1222_v29  ;;  %v1227_v16 = vsub.f32 %v2609_v2, %v1226_v32 }
 0x193   : > { %1008 = vmatpush.msra.mxu1 %v1007_v57  ;;  %1114 = vmatpush.msrb.mxu0 %v987_v19  ;;  %v362_v21 = vpop.trf.xlu2  ;;  %v1250_v19 = vand.u32 4294901760, %v2631_v61 }
 0x194   : > { %1182 = vmatpush.msrb.mxu2 %v2511_v17  ;;  %v2649_v40 = vand.u32 4294901760, %v362_v21  ;;  %v1228_v41 = vand.u32 4294901760, %v1227_v16 }
 0x195   : > { %1014 = vmatpush.msra.mxu1 %v1013_v14  ;;  %1118 = vmatpush.msrb.mxu0 %v993_v26  ;;  %v1245_v26 = vsub.f32 %v2620_v23, %v1244_v25 }
 0x196   : > { %1184 = vmatpush.msrb.mxu2 %v2590_v34  ;;  %v2659_v43 = vsub.f32 %v362_v21, %v2649_v40  ;;  %1229 = vmatpush.msrb.mxu3 %v1228_v41 }
 0x197   : > { %1020 = vmatpush.msra.mxu1 %v1019_v27  ;;  %1122 = vmatpush.msrb.mxu0 %v999_v38  ;;  %v1251_v38 = vsub.f32 %v2631_v61, %v1250_v19  ;;  %v1246_v49 = vand.u32 4294901760, %v1245_v26 }
 0x198   : > { %1186 = vmatpush.msrb.mxu2 %v2568_v44  ;;  %v1256_v48 = vand.u32 4294901760, %v2659_v43  ;;  %1022 = vmatmul.f32.vlgmr.msra.gmra.mxu1 %v2487_v9 }
 0x199   : > { %1149 = vmatpush.msrb.mxu1 %v2489_v10  ;;  %1126 = vmatpush.msrb.mxu0 %v1005_v46  ;;  %v1240_v10 = vand.u32 4294901760, %v1239_v13  ;;  %v1252_v39 = vand.u32 4294901760, %v1251_v38  ;;  %v1714_v46 = vpop.trf.xlu0  ;;  %v2265_v38 = vmov 0  }
 0x19a   : > { %1188 = vmatpush.msrb.mxu2 %v2581_v50  ;;  %1235 = vmatpush.msrb.mxu3 %v1234_v22  ;;  %v280_v22 = vld [vmem:[%s2884_s3] sm:$0x7] }
 0x19b   : > { %1151 = vmatpush.msrb.mxu1 %v2474_v0  ;;  %1130 = vmatpush.msrb.mxu0 %v1011_v54  ;;  %v1257_v0 = vsub.f32 %v2659_v43, %v1256_v48 }
 0x19c   : > { %1190 = vmatpush.msrb.mxu2 %v2585_v53  ;;  %1241 = vmatpush.msrb.mxu3 %v1240_v10 }
 0x19d   : > { %1153 = vmatpush.msrb.mxu1 %v2476_v1  ;;  %1134 = vmatpush.msrb.mxu0 %v1017_v63  ;;  %v1199_v1 = vand.u32 4294901760, %v1198_v35  ;;  %v1258_v51 = vand.u32 4294901760, %v1257_v0 }
 0x19e   : > { %1192 = vmatpush.msrb.mxu2 %v2605_v62  ;;  %1136 = vmatmul.f32.vlgmr.msrb.gmra.mxu0 %v2487_v9 }
 0x19f   : > { %1155 = vmatpush.msrb.mxu1 %v2483_v6  ;;  %1247 = vmatpush.msrb.mxu3 %v1246_v49  ;;  %v1650_v6 = vpop.trf.xlu2 }
 0x1a0   : > { %1275 = vmatpush.msra.mxu0 %v2506_v15  ;;  %1194 = vmatpush.msrb.mxu2 %v2649_v40  ;;  %v2716_v15 = vand.u32 4294901760, %v1714_v46 }
 0x1a1   : > { %1157 = vmatpush.msrb.mxu1 %v2494_v12  ;;  %1253 = vmatpush.msrb.mxu3 %v1252_v39  ;;  %v1618_v12 = vpop.trf.xlu0 }
 0x1a2   : > { %1278 = vmatpush.msra.mxu0 %v2537_v31  ;;  %1345 = vmatpush.msra.mxu2 %v1214_v30  ;;  %v2733_v30 = vand.u32 4294901760, %v1650_v6  ;;  %v2743_v31 = vand.u32 4294901760, %v1618_v12 }
 0x1a3   : > { %1159 = vmatpush.msrb.mxu1 %v2517_v20  ;;  %1200 = vmatmul.f32.vlgmr.msrb.gmra.mxu2 %v1199_v1  ;;  %v2721_v20 = vand.u32 4294901760, %v1682_v45 }
 0x1a4   : > { %1259 = vmatpush.msrb.mxu3 %v1258_v51  ;;  %1281 = vmatpush.msra.mxu0 %v2609_v2  ;;  %v2753_v54 = vsub.f32 %v1650_v6, %v2733_v30  ;;  %v2766_v58 = vsub.f32 %v1618_v12, %v2743_v31 }
 0x1a5   : > { %1349 = vmatpush.msra.mxu2 %v1220_v42  ;;  %1161 = vmatpush.msrb.mxu1 %v2532_v28  ;;  %v1586_v28 = vpop.trf.xlu1 }
 0x1a6   : > { %1388 = vmatpush.msra.mxu3 %v2485_v8  ;;  %1284 = vmatpush.msra.mxu0 %v2598_v59  ;;  %v2755_v55 = vand.u32 4294901760, %v1586_v28  ;;  %v1789_v63 = vand.u32 4294901760, %v2753_v54 }
 0x1a7   : > { %1261 = vmatmul.f32.vlgmr.msrb.gmra.mxu3 %v2611_v60  ;;  %1353 = vmatpush.msra.mxu2 %v1226_v32  ;;  %v1554_v42 = vpop.trf.xlu2 }
 0x1a8   : > { %1163 = vmatpush.msrb.mxu1 %v2548_v36  ;;  %1390 = vmatpush.msra.mxu3 %v2511_v17  ;;  %v2770_v59 = vand.u32 4294901760, %v1554_v42  ;;  %v2779_v2 = vsub.f32 %v1586_v28, %v2755_v55 }
 0x1a9   : > { %1165 = vmatmul.f32.vlgmr.msrb.gmra.mxu1 %v2487_v9  ;;  %1287 = vmatpush.msra.mxu0 %v2615_v7  ;;  %v2731_v9 = vsub.f32 %v1714_v46, %v2716_v15 }
 0x1aa   : > { %1312 = vmatpush.msra.mxu1 %v2485_v8  ;;  %1357 = vmatpush.msra.mxu2 %v1232_v33  ;;  %v1731_v8 = vld.sshfl [vmem:[#allocation1 + $0x8] sm:$0xff pattern:$0x75316420]  ;;  %v2793_v24 = vsub.f32 %v1554_v42, %v2770_v59  ;;  %v1801_v32 = vand.u32 4294901760, %v2779_v2 }
 0x1ab   : > { %1392 = vmatpush.msra.mxu3 %v2590_v34  ;;  %1290 = vmatpush.msra.mxu0 %v2620_v23  ;;  %v1732_v36 = vsel %vm929_vm1, %v1731_v8, 0  ;;  %v1777_v52 = vand.u32 4294901760, %v2731_v9  ;;  %v1795_v23 = vand.u32 4294901760, %v2766_v58 }
 0x1ac   : > { %1314 = vmatpush.msra.mxu1 %v2511_v17  ;;  %1361 = vmatpush.msra.mxu2 %v1238_v37  ;;  %v2739_v17 = vsub.f32 %v1682_v45, %v2721_v20  ;;  %v2763_v56 = vand.u32 4294901760, %v1732_v36  ;;  %v1807_v18 = vand.u32 4294901760, %v2793_v24  ;;  %v1802_v37 = vsub.f32 %v2779_v2, %v1801_v32 }
 0x1ad   : > { %1394 = vmatpush.msra.mxu3 %v2568_v44  ;;  %1293 = vmatpush.msra.mxu0 %v2631_v61  ;;  %v1778_v3 = vsub.f32 %v2731_v9, %v1777_v52  ;;  %v1790_v61 = vsub.f32 %v2753_v54, %v1789_v63  ;;  %v1796_v16 = vsub.f32 %v2766_v58, %v1795_v23 }
 0x1ae   : > { %1316 = vmatpush.msra.mxu1 %v2590_v34  ;;  %1365 = vmatpush.msra.mxu2 %v1244_v25  ;;  %v1522_v34 = vpop.trf.xlu0  ;;  %v1759_v7 = vsub.f32 %v1732_v36, %v2763_v56  ;;  %v1808_v41 = vsub.f32 %v2793_v24, %v1807_v18  ;;  %v1803_v11 = vand.u32 4294901760, %v1802_v37 }
 0x1af   : > { %1396 = vmatpush.msra.mxu3 %v2581_v50  ;;  %1296 = vmatpush.msra.mxu0 %v2659_v43  ;;  %v2783_v4 = vand.u32 4294901760, %v1522_v34  ;;  %v1791_v21 = vand.u32 4294901760, %v1790_v61 }
 0x1b0   : > { %1318 = vmatpush.msra.mxu1 %v2568_v44  ;;  %1369 = vmatpush.msra.mxu2 %v1250_v19  ;;  %v1783_v44 = vand.u32 4294901760, %v2739_v17  ;;  %v1760_v14 = vand.u32 4294901760, %v1759_v7  ;;  %v1809_v43 = vand.u32 4294901760, %v1808_v41 }
 0x1b1   : > { %1299 = vmatmul.f32.vlgmr.msra.gmra.mxu0 %v2642_v5  ;;  %1398 = vmatpush.msra.mxu3 %v2585_v53  ;;  %v2803_v57 = vsub.f32 %v1522_v34, %v2783_v4 }
 0x1b2   : > { %1743 = vmatpush.msrb.mxu0 %v2716_v15  ;;  %1320 = vmatpush.msra.mxu1 %v2581_v50  ;;  %v1490_v50 = vpop.trf.xlu1  ;;  %v1761_v27 = vsub.f32 %v1759_v7, %v1760_v14 }
 0x1b3   : > { %1373 = vmatpush.msra.mxu2 %v1256_v48  ;;  %1400 = vmatpush.msra.mxu3 %v2605_v62  ;;  %v2797_v29 = vand.u32 4294901760, %v1490_v50  ;;  %v1813_v5 = vand.u32 4294901760, %v2803_v57 }
 0x1b4   : > { %1745 = vmatpush.msrb.mxu0 %v2721_v20  ;;  %1322 = vmatpush.msra.mxu1 %v2585_v53  ;;  %v1784_v53 = vsub.f32 %v2739_v17, %v1783_v44  ;;  %v1762_v26 = vand.u32 4294901760, %v1761_v27 }
 0x1b5   : > { %1838 = vmatpush.msrb.mxu2 %v2731_v9  ;;  %1402 = vmatpush.msra.mxu3 %v2649_v40  ;;  %v1818_v33 = vsub.f32 %v1490_v50, %v2797_v29  ;;  %v1814_v19 = vsub.f32 %v2803_v57, %v1813_v5 }
 0x1b6   : > { %1375 = vmatmul.f32.vlgmr.msra.gmra.mxu2 %v2611_v60  ;;  %1747 = vmatpush.msrb.mxu0 %v2733_v30 }
 0x1b7   : > { %1841 = vmatpush.msrb.mxu2 %v2739_v17  ;;  %1324 = vmatpush.msra.mxu1 %v2605_v62  ;;  %v1779_v62 = vand.u32 4294901760, %v1778_v3  ;;  %v1819_v25 = vand.u32 4294901760, %v1818_v33 }
 0x1b8   : > { %1875 = vmatpush.msrb.mxu3 %v2716_v15  ;;  %1749 = vmatpush.msrb.mxu0 %v2743_v31 }
 0x1b9   : > { %1404 = vmatmul.f32.vlgmr.msra.gmra.mxu3 %v2611_v60  ;;  %1844 = vmatpush.msrb.mxu2 %v2753_v54  ;;  %v1785_v60 = vand.u32 4294901760, %v1784_v53  ;;  %v1820_v13 = vsub.f32 %v1818_v33, %v1819_v25 }
 0x1ba   : > { %1326 = vmatpush.msra.mxu1 %v2649_v40  ;;  %1877 = vmatpush.msrb.mxu3 %v2721_v20  ;;  %v1797_v40 = vand.u32 4294901760, %v1796_v16 }
 0x1bb   : > { %1330 = vmatmul.f32.vlgmr.msra.gmra.mxu1 %v1197_v47  ;;  %1751 = vmatpush.msrb.mxu0 %v2755_v55  ;;  %v1815_v47 = vand.u32 4294901760, %v1814_v19  ;;  %v1821_v48 = vand.u32 4294901760, %v1820_v13 }
 0x1bc   : > { %1780 = vmatpush.msrb.mxu1 %v1779_v62  ;;  %1847 = vmatpush.msrb.mxu2 %v2766_v58 }
 0x1bd   : > { %1879 = vmatpush.msrb.mxu3 %v2733_v30  ;;  %1753 = vmatpush.msrb.mxu0 %v2770_v59 }
 0x1be   : > { %1786 = vmatpush.msrb.mxu1 %v1785_v60  ;;  %1850 = vmatpush.msrb.mxu2 %v2779_v2 }
 0x1bf   : > { %1881 = vmatpush.msrb.mxu3 %v2743_v31  ;;  %1755 = vmatpush.msrb.mxu0 %v2783_v4 }
 0x1c0   : > { %1792 = vmatpush.msrb.mxu1 %v1791_v21  ;;  %1853 = vmatpush.msrb.mxu2 %v2793_v24 }
 0x1c1   : > { %1883 = vmatpush.msrb.mxu3 %v2755_v55  ;;  %1757 = vmatpush.msrb.mxu0 %v2797_v29 }
 0x1c2   : > { %1798 = vmatpush.msrb.mxu1 %v1797_v40  ;;  %1856 = vmatpush.msrb.mxu2 %v2803_v57 }
 0x1c3   : > { %1885 = vmatpush.msrb.mxu3 %v2770_v59  ;;  %1908 = vmatpush.msra.mxu0 %v1777_v52 }
 0x1c4   : > { %1804 = vmatpush.msrb.mxu1 %v1803_v11  ;;  %1859 = vmatpush.msrb.mxu2 %v1818_v33 }
 0x1c5   : > { %1887 = vmatpush.msrb.mxu3 %v2783_v4  ;;  %1912 = vmatpush.msra.mxu0 %v1783_v44 }
 0x1c6   : > { %1810 = vmatpush.msrb.mxu1 %v1809_v43  ;;  %1862 = vmatmul.f32.vlgmr.msrb.gmra.mxu2 %v1759_v7 }
 0x1c7   : > { %1889 = vmatpush.msrb.mxu3 %v2797_v29  ;;  %1916 = vmatpush.msra.mxu0 %v1789_v63 }
 0x1c8   : > { %1816 = vmatpush.msrb.mxu1 %v1815_v47  ;;  %1763 = vmatmul.f32.vlgmr.msrb.gmra.mxu0 %v1762_v26 }
 0x1c9   : > { %1920 = vmatpush.msra.mxu0 %v1795_v23  ;;  %1893 = vmatmul.f32.vlgmr.msrb.gmra.mxu3 %v1760_v14 }
 0x1ca   : > { %1822 = vmatpush.msrb.mxu1 %v1821_v48  ;;  %2181 = vset.pattern.permute.xlu2 %v2265_v38 }
 0x1cb   : > { %1924 = vmatpush.msra.mxu0 %v1801_v32  ;;  %1824 = vmatmul.f32.vlgmr.msrb.gmra.mxu1 %v2763_v56 }
 0x1cc   : > { %1951 = vmatpush.msra.mxu1 %v2716_v15  ;;  %1974 = vperm.xlu2 %2181, %v280_v22  }
 0x1cd   : > { %1928 = vmatpush.msra.mxu0 %v1807_v18  ;;  %2182 = vset.pattern.permute.xlu0 %v2265_v38 }
 0x1ce   : > { %1953 = vmatpush.msra.mxu1 %v2721_v20 }
 0x1cf   : > { %1932 = vmatpush.msra.mxu0 %v1813_v5 }
 0x1d0   : > { %1955 = vmatpush.msra.mxu1 %v2733_v30 }
 0x1d1   : > { %1936 = vmatpush.msra.mxu0 %v1819_v25 }
 0x1d2   : > { %1957 = vmatpush.msra.mxu1 %v2743_v31  ;;  %1938 = vmatmul.f32.vlgmr.msra.gmra.mxu0 %v2763_v56 }
 0x1d4   : > { %1959 = vmatpush.msra.mxu1 %v2755_v55 }
 0x1d6   : > { %1961 = vmatpush.msra.mxu1 %v2770_v59 }
 0x1d8   : > { %1963 = vmatpush.msra.mxu1 %v2783_v4 }
 0x1da   : > { %1965 = vmatpush.msra.mxu1 %v2797_v29 }
 0x1db   : > { %1967 = vmatmul.f32.vlgmr.msra.gmra.mxu1 %v2763_v56 }
 0x20b   : > { %v962_v10 = vpop.f32.mrf.mxu0 }
 0x211   : > { %v1092_v39 = vpop.f32.mrf.mxu3 }
 0x214   : > { %v1061_v35 = vpop.f32.mrf.mxu2 }
 0x215   : > { %v1023_v49 = vpop.f32.mrf.mxu1 }
 0x216   : > { %v1024_v0 = vadd.f32 %v1023_v49, %v962_v10 }
 0x218   : > { %v1062_v46 = vadd.f32 %v1061_v35, %v1024_v0 }
 0x21a   : > { %v1093_v6 = vadd.f32 %v1092_v39, %v1062_v46 }
 0x21b   : > { %v1137_v1 = vpop.f32.mrf.mxu0 }
 0x21c   : > { %v1138_v15 = vadd.f32 %v1137_v1, %v1093_v6 }
 0x226   : > { %v1166_v51 = vpop.f32.mrf.mxu1  ;;  %v1201_v45 = vpop.f32.mrf.mxu2 }
 0x227   : > { %v1167_v8 = vadd.f32 %v1166_v51, %v1138_v15  ;;  %v1975_v53 = vpop.permute.xlu2 %1974 }
 0x229   : > { %v1202_v30 = vadd.f32 %v1201_v45, %v1167_v8 }
 0x22a   : > { %v1262_v12 = vpop.f32.mrf.mxu3 }
 0x22b   : > { %v1263_v42 = vadd.f32 %v1262_v12, %v1202_v30 }
 0x22e   : > { %v1300_v20 = vpop.f32.mrf.mxu0 }
 0x22f   : > { %v1301_v55 = vadd.f32 %v1300_v20, %v1263_v42 }
 0x238   : > { %v1331_v28 = vpop.f32.mrf.mxu1 }
 0x239   : > { %v1376_v9 = vpop.f32.mrf.mxu2  ;;  %v1332_v56 = vadd.f32 %v1331_v28, %v1301_v55 }
 0x23b   : > { %v1377_v50 = vadd.f32 %v1376_v9, %v1332_v56 }
 0x23c   : > { %v1405_v17 = vpop.f32.mrf.mxu3 }
 0x23d   : > { %v1406_v2 = vadd.f32 %v1405_v17, %v1377_v50 }
 0x245   : > { %v1764_v31 = vpop.f32.mrf.mxu0 }
 0x248   : > { %v1825_v36 = vpop.f32.mrf.mxu1 }
 0x249   : > { %v1826_v52 = vadd.f32 %v1825_v36, %v1764_v31  ;;  %v1863_v54 = vpop.f32.mrf.mxu2 }
 0x24b   : > { %v1864_v44 = vadd.f32 %v1863_v54, %v1826_v52 }
 0x24c   : > { %v1894_v34 = vpop.f32.mrf.mxu3 }
 0x24d   : > { %v1895_v58 = vadd.f32 %v1894_v34, %v1864_v44 }
 0x24f   : > { %v1939_v59 = vpop.f32.mrf.mxu0 }
 0x250   : > { %v1940_v3 = vadd.f32 %v1939_v59, %v1895_v58 }
 0x258   : > { %v1968_v63 = vpop.f32.mrf.mxu1 }
 0x259   : > { %v1969_v4 = vadd.f32 %v1968_v63, %v1940_v3 }
 0x25b   : > { %v1971_v7 = vadd.f32 %v1969_v4, %v1406_v2 }
 0x25d   : > { %v1977_v23 = vadd.f32 %v1975_v53, %v1971_v7 }
 0x25f   : > { %2183 = vtanh.f32 %v1977_v23 }
 0x265   : > { %v2184_v24 = vpop.eup %2183 }
 0x266   : > { %v1979_v29 = vadd.f32 1.0, %v2184_v24 }
 0x268   : > { %v1980_v62 = vmul.f32 0.5, %v1979_v29 }
 0x26a   : > { %1982 = vst.msk [vmem:[%s278_s8] sm:$0x7] %vm1981_vm2, %v1980_v62 }
 0x26b PF: > { %s15_s21 = sadd.s32 1, %s2258_s21   ;;  %s2889_s15 = smov %s2238_s16 }
 0x26c   : > { %p12_p1 = scmp.ge.s32.totalorder %s15_s21, 6   ;;  %s2890_s16 = smov %s2364_s9 }
 0x26d   : > { %s2891_s17 = smov %s2250_s19  ;;  %s2892_s18 = smov %s2254_s20 }
 0x26e   : > { %s2893_s19 = smov %s2896_s23  ;;  %s2894_s20 = smov %s2900_s24 }
 0x26f   :  { %14 = sbr.rel (!%p12_p1) target bundleno = 4 (0x4), region = 116 }
 0x274   :  { %2010 = vsyncpa [#allocation3], 1 }
 0x275   :  { %2012 = vsyncpa [#allocation3 + $0x1], 1 }

</bundles_post_ra>
